<compile_context>
chip_gen: v6e
topology: v6e:2x2x1
jax: 0.10.0
libtpu: 0.0.40
codegen_flags: <defaults>
</compile_context>

<pallas_src>
import functools

import jax
import jax.numpy as jnp
import numpy as np
from jax.experimental import pallas as pl
from jax.experimental.pallas import tpu as pltpu


def _round_up(x, m):
    return (x + m - 1) // m * m


def _matmul_bias_kernel(w_ref, c_ref, b_ref, o_ref):
    """y^T = W^T @ cols^T + b   (single MXU matmul, lane-dense in/out).

    w_ref : (Cout, Kp)   reshaped + zero-padded conv weight            (VMEM)
    c_ref : (Kp,  M)     im2col slab, M = B*H*W (lane-dense last dim)  (VMEM)
    b_ref : (Cout, 1)    bias column                                   (VMEM)
    o_ref : (Cout, M)    transposed output (lane-dense last dim)       (VMEM)
    """
    acc = jnp.dot(w_ref[...], c_ref[...], preferred_element_type=jnp.float32)
    o_ref[...] = (acc + b_ref[...]).astype(o_ref.dtype)


@functools.partial(jax.jit, static_argnames=("KH", "KW", "pad"))
def conv2d_same_pallas(x_nchw, w_t, bias_col, *, KH, KW, pad):
    """Stride-1 'same' conv2d as a single lane-dense Pallas matmul.

    x_nchw   : (B, Cin, H, W)     PyTorch NCHW input
    w_t      : (Cout, Kp)         weight rows=cout, cols=(kh,kw,cin), zero-padded to Kp
    bias_col : (Cout, 1)
    returns  : (B, Cout, H, W)    NCHW output
    """
    B, Cin, H, W = x_nchw.shape
    Cout, Kp = w_t.shape
    M = B * H * W

    # --- im2col in the wrapper (layout plumbing, XLA side) -------------------
    # Build cols^T with shape (Kp, M): row index = (kh, kw, cin), column index
    # = (b, h, w).  Last (lane) axis is M = B*H*W, a multiple of 128 here, so
    # every kernel load/store is an unmasked, lane-dense vld/vst.
    # TODO(synk): at real LRP conv sizes, replace jnp.pad + stacked slices with
    #             halo-overlapping index_maps to avoid the extra HBM round trip.
    x_nhwc = jnp.transpose(x_nchw, (0, 2, 3, 1))
    xp = jnp.pad(x_nhwc, ((0, 0), (pad, pad), (pad, pad), (0, 0)))
    taps = [xp[:, kh:kh + H, kw:kw + W, :]
            for kh in range(KH) for kw in range(KW)]        # each (B, H, W, Cin)
    cols = jnp.stack(taps, axis=0)                          # (KH*KW, B, H, W, Cin)
    cols = jnp.transpose(cols, (0, 4, 1, 2, 3))             # (KH*KW, Cin, B, H, W)
    cols_t = cols.reshape(KH * KW * Cin, M)                 # (K, M)
    k_real = KH * KW * Cin
    if Kp != k_real:
        cols_t = jnp.pad(cols_t, ((0, Kp - k_real), (0, 0)))

    bytes_accessed = 4 * (w_t.size + cols_t.size + bias_col.size + Cout * M)

    y_t = pl.pallas_call(
        _matmul_bias_kernel,
        out_shape=jax.ShapeDtypeStruct((Cout, M), jnp.float32),
        in_specs=[
            pl.BlockSpec(memory_space=pltpu.MemorySpace.VMEM),
            pl.BlockSpec(memory_space=pltpu.MemorySpace.VMEM),
            pl.BlockSpec(memory_space=pltpu.MemorySpace.VMEM),
        ],
        out_specs=pl.BlockSpec(memory_space=pltpu.MemorySpace.VMEM),
        cost_estimate=pl.CostEstimate(
            flops=2 * Cout * Kp * M,
            transcendentals=0,
            bytes_accessed=bytes_accessed,
        ),
    )(w_t, cols_t, bias_col)

    # (Cout, B*H*W) -> (B, Cout, H, W)  (NCHW, matching the PyTorch module)
    return jnp.transpose(y_t.reshape(Cout, B, H, W), (1, 0, 2, 3))


class OneParamWrapper:
    """JAX/Pallas analog of oneparam_wrapper_class.

    `module` is represented by its Conv2d (weight, bias); `parameter1` (the LRP
    eps/gamma value) is stored but — exactly as in the PyTorch original — has no
    effect on the forward computation (it only drives the custom backward).
    """

    def __init__(self, weight_oihw, bias, parameter1, pad=1):
        Cout, Cin, KH, KW = weight_oihw.shape
        # The kernel implements a stride-1 'same' convolution only.
        assert KH == KW and 2 * pad == KH - 1, (
            "only stride=1, padding=(K-1)/2 ('same') convolution is supported")
        self.KH, self.KW, self.pad = KH, KW, pad
        self.parameter1 = parameter1

        k_real = KH * KW * Cin
        k_pad = _round_up(k_real, 8)
        # (Cout, Cin, KH, KW) -> (Cout, KH, KW, Cin) -> (Cout, K) -> pad K to Kp.
        w_t = jnp.transpose(weight_oihw, (0, 2, 3, 1)).reshape(Cout, k_real)
        self.w_t = jnp.pad(
            w_t, ((0, 0), (0, k_pad - k_real))).astype(jnp.float32)
        self.bias_col = bias.reshape(Cout, 1).astype(jnp.float32)

    def __call__(self, x_nchw):
        return conv2d_same_pallas(
            x_nchw, self.w_t, self.bias_col,
            KH=self.KH, KW=self.KW, pad=self.pad)


if __name__ == "__main__":
    B, Cin, H, W = 2, 4, 16, 16
    Cout, K, pad = 8, 3, 1

    key = jax.random.PRNGKey(0)
    kx, kw, kb = jax.random.split(key, 3)

    x = jax.random.normal(kx, (B, Cin, H, W), dtype=jnp.float32)          # NCHW
    weight = jax.random.normal(kw, (Cout, Cin, K, K), dtype=jnp.float32) * 0.1
    bias = jax.random.normal(kb, (Cout,), dtype=jnp.float32) * 0.1
    parameter1 = 1e-6  # LRP epsilon; forward-pass no-op (backward-only in PyTorch)

    wrapper = OneParamWrapper(weight, bias, parameter1, pad=pad)
    y = wrapper(x)
    y = jax.block_until_ready(y)

    # Silent correctness check against XLA's conv (NCHW, OIHW).
    y_ref = jax.lax.conv_general_dilated(
        x, weight, window_strides=(1, 1), padding=((pad, pad), (pad, pad)),
        dimension_numbers=("NCHW", "OIHW", "NCHW"),
    ) + bias.reshape(1, Cout, 1, 1)
    assert y.shape == (B, Cout, H, W)
    np.testing.assert_allclose(np.asarray(y), np.asarray(y_ref), rtol=1e-5, atol=1e-5)

    print("KERNEL_OK")
</pallas_src>

<mosaic_0001>
module attributes {stable_mosaic.version = 11 : i64} {
  func.func @_matmul_bias_kernel(%arg0: memref<8x40xf32, #tpu.memory_space<vmem>>, %arg1: memref<40x512xf32, #tpu.memory_space<vmem>>, %arg2: memref<8x1xf32, #tpu.memory_space<vmem>>, %arg3: memref<8x512xf32, #tpu.memory_space<vmem>>) attributes {dimension_semantics = [], scalar_prefetch = 0 : i64, scratch_operands = 0 : i64, tpu.core_type = #tpu.core_type<tc>} {
    %c0 = arith.constant 0 : index
    %c0_0 = arith.constant 0 : index
    %0 = vector.load %arg0[%c0, %c0_0] : memref<8x40xf32, #tpu.memory_space<vmem>>, vector<8x40xf32>
    %c0_1 = arith.constant 0 : index
    %c0_2 = arith.constant 0 : index
    %1 = vector.load %arg1[%c0_1, %c0_2] : memref<40x512xf32, #tpu.memory_space<vmem>>, vector<40x512xf32>
    %cst = arith.constant dense<0.000000e+00> : vector<8x512xf32>
    %2 = tpu.matmul %0, %1, %cst {dimension_numbers = #tpu.dot_dimension_numbers<[1], [0], [0], [1], [0, 0, 1, 1], [], []>} : vector<8x40xf32>, vector<40x512xf32>, vector<8x512xf32> -> vector<8x512xf32>
    %c0_3 = arith.constant 0 : index
    %c0_4 = arith.constant 0 : index
    %3 = vector.load %arg2[%c0_3, %c0_4] : memref<8x1xf32, #tpu.memory_space<vmem>>, vector<8x1xf32>
    %4 = vector.broadcast %3 : vector<8x1xf32> to vector<8x512xf32>
    %5 = arith.addf %2, %4 : vector<8x512xf32>
    %c0_5 = arith.constant 0 : index
    %c0_6 = arith.constant 0 : index
    %6 = vector.load %arg3[%c0_5, %c0_6] : memref<8x512xf32, #tpu.memory_space<vmem>>, vector<8x512xf32>
    tpu.vector_store %arg3[%c0_5, %c0_6], %5 {strides = array<i32>} : memref<8x512xf32, #tpu.memory_space<vmem>>, vector<8x512xf32>,
    return
  }
}

</mosaic_0001>

<bundles_post_ra>
// kernel: conv2d_same_pallas.1
= control target key start
LH: loop header
LB: loop body
LE: loop exit
PB: predicated region body
PF: predicated region fallthrough
CT: control target
= control target key end

     0   :  { %v200_v3 = vmov 0.0   ;;  %vm41_vm0 = vcmask 326656   ;;  %v201_v23 = vmov 0   ;;  %s300_s1 = inlined_call_operand.vmem [shape: f32[40,512], index: 1, kind: input, shape index: {}]   ;;  %s301_s0 = inlined_call_operand.vmem [shape: f32[8,40], index: 0, kind: input, shape index: {}]   ;;  %s302_s2 = inlined_call_operand.vmem [shape: f32[8,1], index: 2, kind: input, shape index: {}]   ;;  %s303_s3 = inlined_call_operand.vmem [shape: f32[8,512], index: 3, kind: output, shape index: {}]  }
   0x1   :  { %v32_v0 = vld [vmem:[%s300_s1 + $0x88] sm:$0xff]  ;;  %v34_v1 = vld [vmem:[%s300_s1 + $0x98] sm:$0xff]  ;;  %v31_v2 = vld [vmem:[%s300_s1 + $0x80] sm:$0xff]  ;;  %109 = vmatprep.mubr.f32.mxu0 %v200_v3  ;;  %180 = vmatprep.mubr.f32.mxu1 %v200_v3 }
   0x2   :  { %67 = vmatprep.subr.mxu0 %v32_v0  ;;  %138 = vmatprep.subr.mxu1 %v34_v1  ;;  %v33_v4 = vld [vmem:[%s300_s1 + $0x90] sm:$0xff]  ;;  %v28_v5 = vld [vmem:[%s300_s1 + $0x68] sm:$0xff]  ;;  %v30_v6 = vld [vmem:[%s300_s1 + $0x78] sm:$0xff] }
   0x3   :  { %68 = vmatpush1.msra.mxu0 %v31_v2  ;;  %139 = vmatpush1.msra.mxu1 %v33_v4  ;;  %v27_v7 = vld [vmem:[%s300_s1 + $0x60] sm:$0xff]  ;;  %v29_v8 = vld [vmem:[%s300_s1 + $0x70] sm:$0xff]  ;;  %v24_v9 = vld [vmem:[%s300_s1 + $0x48] sm:$0xff] }
   0x4   :  { %69 = vmatprep.subr.mxu0 %v28_v5  ;;  %140 = vmatprep.subr.mxu1 %v30_v6  ;;  %v26_v10 = vld [vmem:[%s300_s1 + $0x58] sm:$0xff]  ;;  %v23_v11 = vld [vmem:[%s300_s1 + $0x40] sm:$0xff]  ;;  %v25_v12 = vld [vmem:[%s300_s1 + $0x50] sm:$0xff] }
   0x5   :  { %70 = vmatpush1.msra.mxu0 %v27_v7  ;;  %141 = vmatpush1.msra.mxu1 %v29_v8  ;;  %v20_v13 = vld [vmem:[%s300_s1 + $0x28] sm:$0xff]  ;;  %v22_v14 = vld [vmem:[%s300_s1 + $0x38] sm:$0xff]  ;;  %v19_v15 = vld [vmem:[%s300_s1 + $0x20] sm:$0xff] }
   0x6   :  { %71 = vmatprep.subr.mxu0 %v24_v9  ;;  %142 = vmatprep.subr.mxu1 %v26_v10  ;;  %v21_v16 = vld [vmem:[%s300_s1 + $0x30] sm:$0xff]  ;;  %v16_v17 = vld [vmem:[%s300_s1 + $0x8] sm:$0xff]  ;;  %v18_v18 = vld [vmem:[%s300_s1 + $0x18] sm:$0xff] }
   0x7   :  { %72 = vmatpush1.msra.mxu0 %v23_v11  ;;  %143 = vmatpush1.msra.mxu1 %v25_v12  ;;  %v15_v19 = vld [vmem:[%s300_s1] sm:$0xff]  ;;  %v17_v20 = vld [vmem:[%s300_s1 + $0x10] sm:$0xff] }
   0x8   :  { %73 = vmatprep.subr.mxu0 %v20_v13  ;;  %144 = vmatprep.subr.mxu1 %v22_v14  ;;  %v14_v21 = vld [vmem:[%s301_s0] sm:$0xff] }
   0x9   :  { %74 = vmatpush1.msra.mxu0 %v19_v15  ;;  %145 = vmatpush1.msra.mxu1 %v21_v16  ;;  %v35_v22 = vld [vmem:[%s302_s2] sm:$0xff] }
   0xa   :  { %75 = vmatprep.subr.mxu0 %v16_v17  ;;  %146 = vmatprep.subr.mxu1 %v18_v18 }
   0xb   :  { %76 = vmatpush1.msra.mxu0 %v15_v19  ;;  %147 = vmatpush1.msra.mxu1 %v17_v20 }
   0xc   :  { %195 = vmatmul.mubr.msk.f32.vlgmr.msra.gmra.mxu0 %vm41_vm0, %v14_v21  ;;  %196 = vmatmul.mubr.msk.f32.vlgmr.msra.gmra.mxu1 %vm41_vm0, %v14_v21 }
   0xd   :  { %199 = vset.pattern.permute.xlu0 %v201_v23 }
   0xe   :  { %38 = vperm.xlu0 %199, %v35_v22  }
  0x89   :  { %v39_v24 = vpop.permute.xlu0 %38 }
  0xcc   :  { %v111_v25 = vpop.f32.mrf.mxu0  ;;  %v182_v26 = vpop.f32.mrf.mxu1 }
  0xcd   :  { %v112_v27 = vadd.f32 %v111_v25, %v39_v24  ;;  %v183_v28 = vadd.f32 %v182_v26, %v39_v24 }
  0xce   :  { %v113_v29 = vpop.f32.mrf.mxu0  ;;  %v184_v30 = vpop.f32.mrf.mxu1 }
  0xcf   :  { %187 = vst [vmem:[%s303_s3] sm:$0xff] %v112_v27  ;;  %189 = vst [vmem:[%s303_s3 + $0x10] sm:$0xff] %v183_v28  ;;  %v114_v31 = vadd.f32 %v113_v29, %v39_v24  ;;  %v185_v32 = vadd.f32 %v184_v30, %v39_v24 }
  0xd1   :  { %188 = vst [vmem:[%s303_s3 + $0x8] sm:$0xff] %v114_v31  ;;  %190 = vst [vmem:[%s303_s3 + $0x18] sm:$0xff] %v185_v32 }

</bundles_post_ra>
